<compile_context>
chip_gen: v7x
topology: tpu7x:2x2x1
jax: 0.10.0
libtpu: 0.0.40
codegen_flags: <defaults>
</compile_context>

<pallas_src>
import functools
import math

import jax
import jax.numpy as jnp
from jax.experimental import pallas as pl
from jax.experimental.pallas import tpu as pltpu


# ----------------------- per-generation tuning knobs ------------------------
def _vmem_capacity_bytes():
    try:
        info = pltpu.get_tpu_info()
        cap = getattr(info, "vmem_capacity_bytes", None)
        if cap:
            return int(cap)
    except Exception:
        pass
    return 64 * 1024 * 1024  # conservative default (v7x per-TensorCore VMEM)


_VMEM_CAP = _vmem_capacity_bytes()
_VMEM_LIMIT = int(min(_VMEM_CAP * 3 // 4, 100 * 1024 * 1024))
_BIG_VMEM = _VMEM_CAP >= 96 * 1024 * 1024   # v5e/v6e (128 MiB) vs v7x (64 MiB)
_TM_DENSE = 1024 if _BIG_VMEM else 512      # M tile for the H-wide matmuls
_TM_FFN = 512 if _BIG_VMEM else 256         # M tile for the fused FFN kernel
_TI_CAP = None if _BIG_VMEM else 2048       # intermediate tile cap on v7x


def _cparams(*sems):
    return pltpu.CompilerParams(dimension_semantics=sems,
                                vmem_limit_bytes=_VMEM_LIMIT)


def _pick_tile(dim, target):
    """Full dim if small, else the largest power-of-two-ish divisor <= target."""
    if dim <= target:
        return dim
    t = target
    while t >= 128:
        if dim % t == 0:
            return t
        t //= 2
    return dim  # fallback: untiled along this axis (correct, less pipelined)


def _heads_per_step(num_heads, head_dim, seq_len, tq):
    """Heads per attention grid step: lane-aligned block, bounded score temps."""
    H = num_heads * head_dim
    score_budget = max(1, (8 * 1024 * 1024) // max(4 * tq * seq_len, 1))
    for hps in range(num_heads, 0, -1):
        if num_heads % hps:
            continue
        blk = hps * head_dim
        if blk != H and blk % 128:
            continue                          # keep stores/DMAs lane-dense
        if blk > 512 or hps > score_budget:
            continue                          # bound per-step VMEM
        return hps
    return num_heads                          # blk == H: always a legal block


# -------------------- fused QKV: x @ (3,H,H) -> (3, M, H) -------------------
def _dense_qkv_kernel(x_ref, w_ref, b_ref, o_ref):
    x = x_ref[...]
    for i in range(3):                        # three full-lane (tm, H) stores
        y = jnp.dot(x, w_ref[i], preferred_element_type=jnp.float32) + b_ref[i]
        o_ref[i] = y.astype(o_ref.dtype)


def dense_qkv(x, w3, b3, out_dtype=jnp.bfloat16, tm=None):
    # x: (M, H); w3: (3, H, H) resident in VMEM; b3: (3, 1, H) -> (3, M, H)
    M, K = x.shape
    H = w3.shape[2]
    tm = _pick_tile(M, tm or _TM_DENSE)
    return pl.pallas_call(
        _dense_qkv_kernel,
        out_shape=jax.ShapeDtypeStruct((3, M, H), out_dtype),
        grid=(M // tm,),
        in_specs=[
            pl.BlockSpec((tm, K), lambda i: (i, 0)),
            pl.BlockSpec((3, K, H), lambda i: (0, 0, 0)),   # weight-resident
            pl.BlockSpec((3, 1, H), lambda i: (0, 0, 0)),
        ],
        out_specs=pl.BlockSpec((3, tm, H), lambda i: (0, i, 0)),
        compiler_params=_cparams("parallel"),
    )(x, w3, b3)


# ---------- dense (weight-resident) + bias + residual + LayerNorm -----------
def _dense_res_ln_kernel(x_ref, w_ref, b_ref, r_ref, g_ref, bb_ref, o_ref, *,
                         eps):
    y = jnp.dot(x_ref[...], w_ref[...], preferred_element_type=jnp.float32)
    y = y + b_ref[...] + r_ref[...].astype(jnp.float32)
    mu = jnp.mean(y, axis=-1, keepdims=True)
    d = y - mu
    var = jnp.mean(d * d, axis=-1, keepdims=True)
    o_ref[...] = (d * jax.lax.rsqrt(var + eps) * g_ref[...]
                  + bb_ref[...]).astype(o_ref.dtype)


def dense_res_ln(x, w, b, residual, gamma, beta, eps=1e-12,
                 out_dtype=jnp.bfloat16, tm=None):
    M, K = x.shape
    H = w.shape[1]
    tm = _pick_tile(M, tm or _TM_DENSE)
    return pl.pallas_call(
        functools.partial(_dense_res_ln_kernel, eps=eps),
        out_shape=jax.ShapeDtypeStruct((M, H), out_dtype),
        grid=(M // tm,),
        in_specs=[
            pl.BlockSpec((tm, K), lambda i: (i, 0)),
            pl.BlockSpec((K, H), lambda i: (0, 0)),          # weight-resident
            pl.BlockSpec((1, H), lambda i: (0, 0)),
            pl.BlockSpec((tm, H), lambda i: (i, 0)),
            pl.BlockSpec((1, H), lambda i: (0, 0)),
            pl.BlockSpec((1, H), lambda i: (0, 0)),
        ],
        out_specs=pl.BlockSpec((tm, H), lambda i: (i, 0)),
        compiler_params=_cparams("parallel"),
    )(x, w, b.reshape(1, H), residual, gamma.reshape(1, H), beta.reshape(1, H))


# ------ fused FFN: (x @ W1 + b1) -> GELU -> @ W2 + b2 + x -> LayerNorm -------
def _ffn_res_ln_kernel(x_ref, w1_ref, b1_ref, w2_ref, b2_ref, g_ref, bb_ref,
                       o_ref, acc_ref, *, eps):
    j = pl.program_id(1)

    @pl.when(j == 0)
    def _():
        acc_ref[...] = jnp.zeros_like(acc_ref)

    h = jnp.dot(x_ref[...], w1_ref[...],
                preferred_element_type=jnp.float32) + b1_ref[...]
    # TODO(synk): HF 'gelu' is erf-based; tanh approximation used for
    # Mosaic-safe lowering.
    h = 0.5 * h * (1.0 + jnp.tanh(0.7978845608028654 *
                                  (h + 0.044715 * h * h * h)))
    acc_ref[...] += jnp.dot(h.astype(w2_ref.dtype), w2_ref[...],
                            preferred_element_type=jnp.float32)

    @pl.when(j == pl.num_programs(1) - 1)
    def _():
        y = acc_ref[...] + b2_ref[...] + x_ref[...].astype(jnp.float32)
        mu = jnp.mean(y, axis=-1, keepdims=True)
        d = y - mu
        var = jnp.mean(d * d, axis=-1, keepdims=True)
        o_ref[...] = (d * jax.lax.rsqrt(var + eps) * g_ref[...]
                      + bb_ref[...]).astype(o_ref.dtype)


def ffn_res_ln(x, w1, b1, w2, b2, gamma, beta, eps=1e-12,
               out_dtype=jnp.bfloat16, tm=None, ti=None):
    # x: (M, H); w1: (H, I); w2: (I, H).  The (M, I) intermediate never leaves
    # VMEM; the residual is x itself (re-used from the x block in the epilogue).
    M, H = x.shape
    I = w1.shape[1]
    tm = _pick_tile(M, tm or _TM_FFN)
    if ti is None:
        ti = I if (_TI_CAP is None or I <= _TI_CAP) else _pick_tile(I, _TI_CAP)
    return pl.pallas_call(
        functools.partial(_ffn_res_ln_kernel, eps=eps),
        out_shape=jax.ShapeDtypeStruct((M, H), out_dtype),
        grid=(M // tm, I // ti),
        in_specs=[
            pl.BlockSpec((tm, H), lambda i, j: (i, 0)),
            pl.BlockSpec((H, ti), lambda i, j: (0, j)),
            pl.BlockSpec((1, ti), lambda i, j: (0, j)),
            pl.BlockSpec((ti, H), lambda i, j: (j, 0)),
            pl.BlockSpec((1, H), lambda i, j: (0, 0)),
            pl.BlockSpec((1, H), lambda i, j: (0, 0)),
            pl.BlockSpec((1, H), lambda i, j: (0, 0)),
        ],
        out_specs=pl.BlockSpec((tm, H), lambda i, j: (i, 0)),
        scratch_shapes=[pltpu.VMEM((tm, H), jnp.float32)],
        compiler_params=_cparams("parallel", "arbitrary"),
    )(x, w1, b1.reshape(1, I), w2, b2.reshape(1, H),
      gamma.reshape(1, H), beta.reshape(1, H))


# ----------------------- standalone LayerNorm (embeddings) ------------------
def _ln_kernel(x_ref, g_ref, b_ref, o_ref, *, eps):
    h = x_ref[...].astype(jnp.float32)
    mu = jnp.mean(h, axis=-1, keepdims=True)
    d = h - mu
    var = jnp.mean(d * d, axis=-1, keepdims=True)
    o_ref[...] = (d * jax.lax.rsqrt(var + eps) * g_ref[...]
                  + b_ref[...]).astype(o_ref.dtype)


def layernorm(x, gamma, beta, eps=1e-12, out_dtype=jnp.bfloat16, tm=1024):
    M, H = x.shape
    tm = _pick_tile(M, tm)
    return pl.pallas_call(
        functools.partial(_ln_kernel, eps=eps),
        out_shape=jax.ShapeDtypeStruct((M, H), out_dtype),
        grid=(M // tm,),
        in_specs=[
            pl.BlockSpec((tm, H), lambda i: (i, 0)),
            pl.BlockSpec((1, H), lambda i: (0, 0)),
            pl.BlockSpec((1, H), lambda i: (0, 0)),
        ],
        out_specs=pl.BlockSpec((tm, H), lambda i: (i, 0)),
        compiler_params=_cparams("parallel"),
    )(x, gamma.reshape(1, H), beta.reshape(1, H))


# ------------------- masked scaled-dot-product attention --------------------
def _attn_kernel(q_ref, k_ref, v_ref, m_ref, o_ref, *, hps, head_dim, scale):
    # Apply the softmax scale once to q (not to the SxS score matrix per head).
    q_all = (q_ref[0, 0].astype(jnp.float32) * scale).astype(q_ref.dtype)
    k_all = k_ref[0, 0]                # (S, blk) bf16
    v_all = v_ref[0, 0]
    m = m_ref[0]                       # (1, S) additive mask, f32
    ctxs = []
    for h in range(hps):               # small static loop; one ctx kept per head
        lo, hi = h * head_dim, (h + 1) * head_dim
        q = q_all[:, lo:hi]
        k = k_all[:, lo:hi]
        v = v_all[:, lo:hi]
        # q @ k^T via contracting dims (no explicit transpose through the XLU)
        s = jax.lax.dot_general(q, k, (((1,), (1,)), ((), ())),
                                preferred_element_type=jnp.float32)
        s = s + m
        s = s - jnp.max(s, axis=-1, keepdims=True)
        p = jnp.exp(s)
        denom = jnp.sum(p, axis=-1, keepdims=True)
        ctx = jnp.dot(p.astype(v.dtype), v, preferred_element_type=jnp.float32)
        ctxs.append(ctx * pl.reciprocal(denom, approx=True))
    # Single lane-dense (tq, blk) store instead of per-head 64-lane stores.
    o_ref[0] = jnp.concatenate(ctxs, axis=-1).astype(o_ref.dtype)


def attention(qkv, add_mask, num_heads, head_dim, scale,
              out_dtype=jnp.bfloat16):
    # qkv: (3, B, S, H); add_mask: (B, 1, S) additive mask (f32).
    _, B, S, H = qkv.shape
    tq = _pick_tile(S, 256)                       # query-row tiling (v7x/long S)
    hps = _heads_per_step(num_heads, head_dim, S, tq)
    blk = hps * head_dim
    nblk = num_heads // hps
    n_q = S // tq

    def q_spec():
        return pl.BlockSpec((1, 1, tq, blk), lambda b, h, qi: (0, b, qi, h))

    def kv_spec(which):
        # k/v block index does not depend on qi -> fetched once per (b, h).
        return pl.BlockSpec((1, 1, S, blk),
                            lambda b, h, qi, w=which: (w, b, 0, h))

    return pl.pallas_call(
        functools.partial(_attn_kernel, hps=hps, head_dim=head_dim,
                          scale=scale),
        out_shape=jax.ShapeDtypeStruct((B, S, H), out_dtype),
        grid=(B, nblk, n_q),
        in_specs=[q_spec(), kv_spec(1), kv_spec(2),
                  pl.BlockSpec((1, 1, S), lambda b, h, qi: (b, 0, 0))],
        out_specs=pl.BlockSpec((1, tq, blk), lambda b, h, qi: (b, qi, h)),
        compiler_params=_cparams("parallel", "parallel", "parallel"),
    )(qkv, qkv, qkv, add_mask)


# ------------------------------ BERT encoder --------------------------------
def bert_layer(x, add_mask, p, B, S, H, num_heads, out_dtype):
    M = B * S
    dh = H // num_heads

    qkv = dense_qkv(x, p["w_qkv"], p["b_qkv"])              # (3, M, H)
    qkv = qkv.reshape(3, B, S, H)                           # leading-dim reshape
    ctx = attention(qkv, add_mask, num_heads, dh,
                    scale=1.0 / math.sqrt(dh))              # (B, S, H)
    ctx = ctx.reshape(M, H)

    x = dense_res_ln(ctx, p["wo"], p["bo"], x, p["ln1_g"], p["ln1_b"])
    x = ffn_res_ln(x, p["w1"], p["b1"], p["w2"], p["b2"],
                   p["ln2_g"], p["ln2_b"], out_dtype=out_dtype)
    return x


def bert_forward(params, cfg, input_ids, segs, mask):
    """Equivalent of Bert.forward(x, segs, mask) -> last_hidden_state."""
    B, S = input_ids.shape
    H = cfg["hidden"]

    # Embedding lookups (gather = JAX glue), then LayerNorm in Pallas.
    pos = jnp.arange(S, dtype=jnp.int32)
    emb = (params["word_emb"][input_ids]
           + params["pos_emb"][pos][None, :, :]
           + params["type_emb"][segs])
    x = layernorm(emb.reshape(B * S, H), params["emb_ln_g"],
                  params["emb_ln_b"])

    # HF extended attention mask: 1 -> keep (+0), 0 -> masked (-10000 added).
    add_mask = ((1.0 - mask.astype(jnp.float32)) * -10000.0)[:, None, :]

    n_layers = len(params["layers"])
    for li, layer in enumerate(params["layers"]):
        out_dtype = jnp.float32 if li == n_layers - 1 else jnp.bfloat16
        x = bert_layer(x, add_mask, layer, B, S, H, cfg["num_heads"],
                       out_dtype)

    return x.reshape(B, S, H)  # top_vec / last_hidden_state


# --------------------------- deterministic params ---------------------------
def init_bert_params(key, cfg):
    H, I = cfg["hidden"], cfg["intermediate"]

    def normal(k, shape, dtype=jnp.bfloat16):
        return (0.02 * jax.random.normal(k, shape, dtype=jnp.float32)).astype(dtype)

    n_keys = 3 + 4 * cfg["num_layers"]
    keys = iter(jax.random.split(key, n_keys))

    params = {
        "word_emb": normal(next(keys), (cfg["vocab_size"], H), jnp.float32),
        "pos_emb": normal(next(keys), (cfg["max_pos"], H), jnp.float32),
        "type_emb": normal(next(keys), (cfg["type_vocab"], H), jnp.float32),
        "emb_ln_g": jnp.ones((H,), jnp.float32),
        "emb_ln_b": jnp.zeros((H,), jnp.float32),
        "layers": [],
    }
    for _ in range(cfg["num_layers"]):
        layer = {
            "w_qkv": normal(next(keys), (3, H, H)),          # fused Q/K/V
            "b_qkv": jnp.zeros((3, 1, H), jnp.float32),
            "wo": normal(next(keys), (H, H)), "bo": jnp.zeros((H,), jnp.float32),
            "ln1_g": jnp.ones((H,), jnp.float32),
            "ln1_b": jnp.zeros((H,), jnp.float32),
            "w1": normal(next(keys), (H, I)), "b1": jnp.zeros((I,), jnp.float32),
            "w2": normal(next(keys), (I, H)), "b2": jnp.zeros((H,), jnp.float32),
            "ln2_g": jnp.ones((H,), jnp.float32),
            "ln2_b": jnp.zeros((H,), jnp.float32),
        }
        params["layers"].append(layer)
    return params


if __name__ == "__main__":
    cfg = dict(vocab_size=64, hidden=32, num_layers=2, num_heads=4,
               intermediate=128, max_pos=32, type_vocab=2)
    B, S = 2, 8

    key = jax.random.PRNGKey(0)
    kp, kx = jax.random.split(key, 2)

    params = init_bert_params(kp, cfg)

    x = jax.random.randint(kx, (B, S), 0, cfg["vocab_size"], dtype=jnp.int32)
    segs = jnp.concatenate(
        [jnp.zeros((B, S // 2), jnp.int32), jnp.ones((B, S // 2), jnp.int32)],
        axis=1)
    mask = jnp.array([[1, 1, 1, 1, 1, 1, 1, 0],
                      [1, 1, 1, 1, 1, 0, 0, 0]], dtype=jnp.float32)

    top_vec = bert_forward(params, cfg, x, segs, mask)
    jax.block_until_ready(top_vec)

    assert top_vec.shape == (B, S, cfg["hidden"])
    assert top_vec.dtype == jnp.float32
    assert bool(jnp.all(jnp.isfinite(top_vec)))
    print("KERNEL_OK")
</pallas_src>

<mosaic_0001>
module attributes {stable_mosaic.version = 11 : i64} {
  func.func @_ln_kernel(%arg0: i32, %arg1: memref<16x32xf32, #tpu.memory_space<vmem>>, %arg2: memref<1x32xf32, #tpu.memory_space<vmem>>, %arg3: memref<1x32xf32, #tpu.memory_space<vmem>>, %arg4: memref<16x32xbf16, #tpu.memory_space<vmem>>) attributes {dimension_semantics = [#tpu.dimension_semantics<parallel>], iteration_bounds = array<i64: 1>, scalar_prefetch = 0 : i64, scratch_operands = 0 : i64, tpu.core_type = #tpu.core_type<tc>, window_params = [{transform_indices = @transform_0, window_bounds = array<i64: 16, 32>}, {pipeline_mode = #tpu.pipeline_mode<synchronous>, transform_indices = @transform_1, window_bounds = array<i64: 1, 32>}, {pipeline_mode = #tpu.pipeline_mode<synchronous>, transform_indices = @transform_2, window_bounds = array<i64: 1, 32>}, {transform_indices = @transform_3, window_bounds = array<i64: 16, 32>}]} {
    %c0 = arith.constant 0 : index
    %c0_0 = arith.constant 0 : index
    %0 = vector.load %arg1[%c0, %c0_0] : memref<16x32xf32, #tpu.memory_space<vmem>>, vector<16x32xf32>
    %cst = arith.constant dense<0.000000e+00> : vector<16xf32>
    %1 = vector.multi_reduction <add>, %0, %cst [1] : vector<16x32xf32> to vector<16xf32>
    %2 = vector.shape_cast %1 : vector<16xf32> to vector<16x1xf32>
    %cst_1 = arith.constant 3.200000e+01 : f32
    %3 = vector.broadcast %cst_1 : f32 to vector<16x1xf32>
    %4 = arith.divf %2, %3 : vector<16x1xf32>
    %5 = vector.broadcast %4 : vector<16x1xf32> to vector<16x32xf32>
    %6 = arith.subf %0, %5 : vector<16x32xf32>
    %7 = arith.mulf %6, %6 : vector<16x32xf32>
    %cst_2 = arith.constant dense<0.000000e+00> : vector<16xf32>
    %8 = vector.multi_reduction <add>, %7, %cst_2 [1] : vector<16x32xf32> to vector<16xf32>
    %9 = vector.shape_cast %8 : vector<16xf32> to vector<16x1xf32>
    %cst_3 = arith.constant 3.200000e+01 : f32
    %10 = vector.broadcast %cst_3 : f32 to vector<16x1xf32>
    %11 = arith.divf %9, %10 : vector<16x1xf32>
    %cst_4 = arith.constant 9.99999996E-13 : f32
    %12 = vector.broadcast %cst_4 : f32 to vector<16x1xf32>
    %13 = arith.addf %11, %12 : vector<16x1xf32>
    %14 = math.rsqrt %13 : vector<16x1xf32>
    %15 = vector.broadcast %14 : vector<16x1xf32> to vector<16x32xf32>
    %16 = arith.mulf %6, %15 : vector<16x32xf32>
    %c0_5 = arith.constant 0 : index
    %c0_6 = arith.constant 0 : index
    %17 = vector.load %arg2[%c0_5, %c0_6] : memref<1x32xf32, #tpu.memory_space<vmem>>, vector<1x32xf32>
    %18 = vector.broadcast %17 : vector<1x32xf32> to vector<16x32xf32>
    %19 = arith.mulf %16, %18 : vector<16x32xf32>
    %c0_7 = arith.constant 0 : index
    %c0_8 = arith.constant 0 : index
    %20 = vector.load %arg3[%c0_7, %c0_8] : memref<1x32xf32, #tpu.memory_space<vmem>>, vector<1x32xf32>
    %21 = vector.broadcast %20 : vector<1x32xf32> to vector<16x32xf32>
    %22 = arith.addf %19, %21 : vector<16x32xf32>
    %23 = arith.truncf %22 : vector<16x32xf32> to vector<16x32xbf16>
    %c0_9 = arith.constant 0 : index
    %c0_10 = arith.constant 0 : index
    %24 = vector.load %arg4[%c0_9, %c0_10] : memref<16x32xbf16, #tpu.memory_space<vmem>>, vector<16x32xbf16>
    tpu.vector_store %arg4[%c0_9, %c0_10], %23 {strides = array<i32>} : memref<16x32xbf16, #tpu.memory_space<vmem>>, vector<16x32xbf16>,
    return
  }
  func.func @transform_0(%arg0: i32) -> (i32, i32) {
    %c0_i32 = arith.constant 0 : i32
    %c0_i32_0 = arith.constant 0 : i32
    return %arg0, %c0_i32 : i32, i32
  }
  func.func @transform_1(%arg0: i32) -> (i32, i32) {
    %c0_i32 = arith.constant 0 : i32
    %c0_i32_0 = arith.constant 0 : i32
    %c0_i32_1 = arith.constant 0 : i32
    return %c0_i32, %c0_i32_0 : i32, i32
  }
  func.func @transform_2(%arg0: i32) -> (i32, i32) {
    %c0_i32 = arith.constant 0 : i32
    %c0_i32_0 = arith.constant 0 : i32
    %c0_i32_1 = arith.constant 0 : i32
    return %c0_i32, %c0_i32_0 : i32, i32
  }
  func.func @transform_3(%arg0: i32) -> (i32, i32) {
    %c0_i32 = arith.constant 0 : i32
    %c0_i32_0 = arith.constant 0 : i32
    return %arg0, %c0_i32 : i32, i32
  }
}

</mosaic_0001>

<bundles_post_ra>
// kernel: tpu_custom_call.1
= control target key start
LH: loop header
LB: loop body
LE: loop exit
PB: predicated region body
PF: predicated region fallthrough
CT: control target
= control target key end

     0   :  { %8 = vsyncpa [#allocation3], 0  ;;  %s229_s0 = inlined_call_operand.hbm [shape: f32[16,32], index: 0, kind: input, shape index: {}]   ;;  %s230_s1 = inlined_call_operand.vmem [shape: f32[1,32], index: 1, kind: input, shape index: {}]   ;;  %s231_s2 = inlined_call_operand.vmem [shape: f32[1,32], index: 2, kind: input, shape index: {}]   ;;  %s232_s3 = inlined_call_operand.hbm [shape: bf16[16,32], index: 3, kind: output, shape index: {}]  }
   0x1   :  { %9 = vsyncpa [#allocation4], 0  ;;  %s169_s12 = smov [#allocation2]   ;;  %s121_s16 = scalar_lea.hbm %s229_s0, 256 }
   0x2   :  { %s15_s13 = sshll.u32 %s169_s12, 4  ;;  %p122_p0 = scmp.ne.s32.totalorder %s229_s0, %s121_s16  ;;  %s16_s13 = int_to_ptr.vmem [resolvable:$true] %s15_s13 }
   0x3   :  { %p125_p1 = scmp.lt.u32.totalorder %s121_s16, %s229_s0 }
   0x5   :  { %p127_p2 = pnand %p125_p1, %p122_p0 }
   0x7   :  { %130 = shalt.err (!%p127_p2)
}
   0x8   :  { %s131_s21 = scalar_lea.vmem %s16_s13, 256  ;;  %p136_p4 = scmp.lt.s32.totalorder %s16_s13, %s16_s13 }
   0x9   :  { %p132_p3 = scmp.ne.s32.totalorder %s16_s13, %s131_s21  ;;  %p137_p5 = scmp.lt.s32.totalorder %s131_s21, %s131_s21 }
   0xb   :  { %p138_p6 = por %p137_p5, %p136_p4 }
   0xd   :  { %p139_p7 = pnand %p138_p6, %p132_p3 }
   0xf   :  { %142 = shalt.err (!%p139_p7)
}
  0x10   :  { %s170_s22 = smov 128   ;;  %s171_s23 = smov 8  }
  0x11   :  { %21 = dma.hbm_to_vmem [thread:$0]  %s229_s0, 256, %s16_s13, [#allocation3], %s170_s22, %s170_s22, %s171_s23  }
  0x12   :  { %165 = dma.done.wait [#allocation3], 256  }
  0x13   :  { %166 = vsyncadd [#allocation3], 4294967040  ;;  %vm31_vm0 = vcmask 261120   ;;  %v29_v0 = vld [vmem:[#allocation2] sm:$0xff]  ;;  %v30_v1 = vld [vmem:[#allocation2 + $0x8] sm:$0xff]  ;;  %vm85_vm1 = vcmask 257024  }
  0x14   :  { %v32_v2 = vsel %vm31_vm0, %v29_v0, 0.0  ;;  %v35_v3 = vsel %vm31_vm0, %v30_v1, 0.0  ;;  %v105_v21 = vld [vmem:[%s230_s1] ss:$0 sm:$0xff]  ;;  %s172_s29 = smov [#allocation5]  }
  0x15   :  { %33 = vadd.xlane.f32.xlu0 %v32_v2  ;;  %v106_v23 = vld [vmem:[%s231_s2] ss:$0 sm:$0xff]  ;;  %s93_s30 = sshll.u32 %s172_s29, 4  ;;  %s94_s30 = int_to_ptr.vmem [resolvable:$true] %s93_s30 }
  0x16   :  { %s143_s1 = scalar_lea.vmem %s94_s30, 128  ;;  %p148_p9 = scmp.lt.s32.totalorder %s94_s30, %s94_s30 }
  0x17   :  { %p144_p8 = scmp.ne.s32.totalorder %s94_s30, %s143_s1  ;;  %p149_p10 = scmp.lt.s32.totalorder %s143_s1, %s143_s1 }
  0x19   :  { %36 = vadd.xlane.f32.xlu0 %v35_v3  ;;  %p150_p11 = por %p149_p10, %p148_p9 }
  0x1b   :  { %p151_p12 = pnand %p150_p11, %p144_p8 }
  0xa2   :  { %v34_v4 = vpop.xlane.xlu0 %33 }
  0xa3   :  { %v39_v5 = vmul.f32 0.03125, %v34_v4 }
  0xa5   :  { %v41_v6 = vsub.f32 %v29_v0, %v39_v5 }
  0xa6   :  { %v37_v7 = vpop.xlane.xlu0 %36 }
  0xa7   :  { %v40_v8 = vmul.f32 0.03125, %v37_v7  ;;  %v43_v9 = vmul.f32 %v41_v6, %v41_v6 }
  0xa9   :  { %v42_v10 = vsub.f32 %v30_v1, %v40_v8  ;;  %v45_v11 = vsel %vm31_vm0, %v43_v9, 0.0 }
  0xaa   :  { %46 = vadd.xlane.f32.xlu1 %v45_v11 }
  0xab   :  { %v44_v12 = vmul.f32 %v42_v10, %v42_v10 }
  0xad   :  { %v48_v13 = vsel %vm31_vm0, %v44_v12, 0.0 }
  0xae   :  { %49 = vadd.xlane.f32.xlu1 %v48_v13 }
 0x137   :  { %v47_v14 = vpop.xlane.xlu1 %46 }
 0x138   :  { %v51_v15 = vmul.f32 0.03125, %v47_v14 }
 0x13a   :  { %v53_v16 = vadd.f32 1e-12, %v51_v15 }
 0x13b   :  { %v50_v17 = vpop.xlane.xlu1 %49 }
 0x13c   :  { %117 = vrsqrt.f32 %v53_v16  ;;  %v52_v18 = vmul.f32 0.03125, %v50_v17 }
 0x13e   :  { %v54_v19 = vadd.f32 1e-12, %v52_v18 }
 0x140   :  { %119 = vrsqrt.f32 %v54_v19 }
 0x146   :  { %v118_v20 = vpop.eup %117 }
 0x147   :  { %v57_v22 = vmul.f32 %v118_v20, %v41_v6 }
 0x149   :  { %v66_v24 = vmul.f32 %v105_v21, %v57_v22 }
 0x14a   :  { %v120_v25 = vpop.eup %119 }
 0x14b   :  { %v58_v26 = vmul.f32 %v120_v25, %v42_v10  ;;  %v75_v27 = vadd.f32 %v106_v23, %v66_v24 }
 0x14d   :  { %v67_v28 = vmul.f32 %v105_v21, %v58_v26  ;;  %v109_v29 = vpack.c.bf16 %v75_v27, %v75_v27 }
 0x14f   :  { %v76_v30 = vadd.f32 %v106_v23, %v67_v28  ;;  %86 = vst.msk [vmem:[#allocation5] sm:$0xf] %vm85_vm1, %v109_v29 }
 0x151   :  { %v110_v31 = vpack.c.bf16 %v76_v30, %v76_v30 }
 0x153   :  { %87 = vst.msk [vmem:[#allocation5 + $0x4] sm:$0xf] %vm85_vm1, %v110_v31 }
 0x154   :  { %154 = shalt.err (!%p151_p12)
}
 0x155   :  { %s155_s5 = scalar_lea.hbm %s232_s3, 128 }
 0x156   :  { %p156_p13 = scmp.ne.s32.totalorder %s232_s3, %s155_s5  ;;  %p159_p0 = scmp.lt.u32.totalorder %s155_s5, %s232_s3 }
 0x158   :  { %p161_p1 = pnand %p159_p0, %p156_p13 }
 0x15a   :  { %164 = shalt.err (!%p161_p1)
}
 0x15b   :  { %s173_s10 = smov 64   ;;  %s174_s11 = smov 4  }
 0x15c   :  { %99 = dma.vmem_to_hbm [thread:$0]  %s94_s30, 128, %s232_s3, [#allocation4], %s173_s10, %s173_s10, %s174_s11  }
 0x15d   :  { %167 = dma.done.wait [#allocation4], 128  }
 0x15e   :  { %168 = vsyncadd [#allocation4], 4294967168 }
 0x15f   :  { %103 = vsyncpa [#allocation3], 1 }
 0x160   :  { %104 = vsyncpa [#allocation4], 1 }

</bundles_post_ra>
